<compile_context>
chip_gen: v6e
topology: v6e:2x2x1
jax: 0.10.0
libtpu: 0.0.40
codegen_flags: <defaults>
</compile_context>

<pallas_src>
import functools

import jax
import jax.numpy as jnp
from jax.experimental import pallas as pl
from jax.experimental.pallas import tpu as pltpu

LANE = 128        # vreg lane width (same on v5e/v6e/v7x)
ROW_TILE = 16     # bf16 packs 16 rows per vreg; keep batch tiles multiples of this
MIN_SPLIT = 256   # min rows per tile when splitting a single-step batch across 2 TCs


def _round_up(n, m):
    return ((n + m - 1) // m) * m


def _mlp_kernel(x_ref, w1_ref, b1_ref, w2_ref, b2_ref, w3_ref, b3_ref, o_ref):
    # x_ref: (TM, Din) f32 batch tile (feature dim unpadded).  Weights/biases are full,
    # resident in VMEM across the whole grid (constant index_maps).  Cast to bf16 on the
    # VPU (free slack), three fused MXU matmuls with f32 accumulation, f32 bias + ReLU
    # epilogues, bf16 store.
    cdt = w1_ref.dtype
    x = x_ref[...].astype(cdt)
    h1 = jnp.dot(x, w1_ref[...], preferred_element_type=jnp.float32) + b1_ref[...]
    h1 = jnp.maximum(h1, 0.0).astype(cdt)
    h2 = jnp.dot(h1, w2_ref[...], preferred_element_type=jnp.float32) + b2_ref[...]
    h2 = jnp.maximum(h2, 0.0).astype(cdt)
    y = jnp.dot(h2, w3_ref[...], preferred_element_type=jnp.float32) + b3_ref[...]
    o_ref[...] = y.astype(o_ref.dtype)


def init_mlp_params(key, input_dim, hidden1, hidden2, output):
    """PyTorch nn.Linear-style init: U(-1/sqrt(fan_in), 1/sqrt(fan_in)).
    Weights returned already transposed to (in, out); biases as (out,). f32, unpadded."""
    def linear(k, fan_in, fan_out):
        kw, kb = jax.random.split(k)
        bound = 1.0 / jnp.sqrt(jnp.float32(fan_in))
        w = jax.random.uniform(kw, (fan_in, fan_out), jnp.float32, -bound, bound)
        b = jax.random.uniform(kb, (fan_out,), jnp.float32, -bound, bound)
        return w, b

    k1, k2, k3 = jax.random.split(key, 3)
    w1, b1 = linear(k1, input_dim, hidden1)
    w2, b2 = linear(k2, hidden1, hidden2)
    w3, b3 = linear(k3, hidden2, output)
    return (w1, b1, w2, b2, w3, b3)


def prepare_params(params, compute_dtype=jnp.bfloat16):
    """One-time prep. Only the *hidden* feature dims are zero-padded to 128 (the padded
    h1/h2 columns stay exactly 0 through bias+ReLU, so padded w2/w3 rows contribute
    nothing).  The input dim of w1 and the output dim of w3 stay unpadded so activations
    move through HBM at their true width.  Weights -> bf16; biases stay f32 (added to
    the f32 dot accumulator)."""
    w1, b1, w2, b2, w3, b3 = params
    h1 = w1.shape[1]
    h2 = w2.shape[1]
    out = w3.shape[1]
    h1_p = _round_up(h1, LANE)
    h2_p = _round_up(h2, LANE)

    w1p = jnp.pad(w1, ((0, 0), (0, h1_p - h1))).astype(compute_dtype)
    b1p = jnp.pad(b1, (0, h1_p - h1)).reshape(1, h1_p).astype(jnp.float32)
    w2p = jnp.pad(w2, ((0, h1_p - h1), (0, h2_p - h2))).astype(compute_dtype)
    b2p = jnp.pad(b2, (0, h2_p - h2)).reshape(1, h2_p).astype(jnp.float32)
    w3p = jnp.pad(w3, ((0, h2_p - h2), (0, 0))).astype(compute_dtype)
    b3p = b3.reshape(1, out).astype(jnp.float32)
    return (w1p, b1p, w2p, b2p, w3p, b3p)


@functools.partial(jax.jit, static_argnames=("tm",))
def mlp_forward(x, padded_params, *, tm=1024):
    """x: any shape flattening to (-1, input_dim). Returns (B, out_dim) bf16."""
    w1, b1, w2, b2, w3, b3 = padded_params
    input_dim = w1.shape[0]          # unpadded
    h1_p = w1.shape[1]
    h2_p = w2.shape[1]
    out_dim = w3.shape[1]            # unpadded

    x2d = x.reshape(-1, input_dim)   # glue: PyTorch x.view(-1, input)
    batch = x2d.shape[0]

    # ---- batch tile selection ------------------------------------------------------
    # Large tiles amortize per-grid-step overhead; tiles are multiples of 16 rows for
    # bf16 sublane packing.  If the whole batch would fit in a single step but is large
    # enough, split it into 2 steps so the "parallel" axis can shard across both v7x TCs.
    batch_aligned = _round_up(batch, ROW_TILE)
    n_steps = max(1, pl.cdiv(batch_aligned, tm))
    if n_steps == 1 and batch_aligned >= 2 * MIN_SPLIT:
        n_steps = 2
    tm_eff = _round_up(pl.cdiv(batch_aligned, n_steps), ROW_TILE)
    batch_p = _round_up(batch, tm_eff)
    grid = (batch_p // tm_eff,)

    # Pad batch rows only (no feature-dim padding, no dtype cast in the wrapper).
    if batch_p != batch:
        x2d = jnp.pad(x2d, ((0, batch_p - batch), (0, 0)))

    # ---- cost / VMEM accounting ----------------------------------------------------
    flops = 2 * batch_p * (input_dim * h1_p + h1_p * h2_p + h2_p * out_dim)
    param_bytes = sum(int(p.size) * p.dtype.itemsize for p in padded_params)
    bytes_accessed = (
        batch_p * input_dim * 4          # x in (f32)
        + param_bytes                    # weights/biases, read once
        + batch_p * out_dim * 2          # out (bf16)
    )
    # Double-buffered activation tiles + (conservatively double-buffered) resident params.
    vmem_needed = 2 * tm_eff * (input_dim * 4 + out_dim * 2) + 2 * param_bytes
    vmem_limit = int(min(max(2 * vmem_needed, 8 << 20), 32 << 20))

    out_p = pl.pallas_call(
        _mlp_kernel,
        out_shape=jax.ShapeDtypeStruct((batch_p, out_dim), jnp.bfloat16),
        grid=grid,
        in_specs=[
            # x: tiled over batch, feature dim left at its true (full-array) width.
            pl.BlockSpec((tm_eff, input_dim), lambda i: (i, 0)),
            # weights/biases: constant index_map -> DMA'd once, resident across the grid.
            pl.BlockSpec((input_dim, h1_p), lambda i: (0, 0)),
            pl.BlockSpec((1, h1_p), lambda i: (0, 0)),
            pl.BlockSpec((h1_p, h2_p), lambda i: (0, 0)),
            pl.BlockSpec((1, h2_p), lambda i: (0, 0)),
            pl.BlockSpec((h2_p, out_dim), lambda i: (0, 0)),
            pl.BlockSpec((1, out_dim), lambda i: (0, 0)),
        ],
        out_specs=pl.BlockSpec((tm_eff, out_dim), lambda i: (i, 0)),
        compiler_params=pltpu.CompilerParams(
            dimension_semantics=("parallel",),       # megacore-shard batch on v7x
            vmem_limit_bytes=vmem_limit),
        cost_estimate=pl.CostEstimate(
            flops=flops, transcendentals=0, bytes_accessed=bytes_accessed),
    )(x2d, w1, b1, w2, b2, w3, b3)

    # Trim only padded batch rows (no-op when the batch was already tile-aligned).
    return out_p[:batch, :]


def _reference(x2d, params):
    w1, b1, w2, b2, w3, b3 = params
    h = jnp.maximum(x2d @ w1 + b1, 0.0)
    h = jnp.maximum(h @ w2 + b2, 0.0)
    return h @ w3 + b3


if __name__ == "__main__":
    key = jax.random.PRNGKey(0)
    kx, kp, kx2, kx3 = jax.random.split(key, 4)

    # Small module shapes: input=32, hidden1=64, hidden2=48, output=16.
    input_dim, hidden1, hidden2, output = 32, 64, 48, 16

    params = init_mlp_params(kp, input_dim, hidden1, hidden2, output)
    pparams = prepare_params(params)                       # hidden-dim pad + bf16, once

    # Test 1: tiny batch — x flattens via view(-1, 32) -> (8, 32); single grid step with
    # 8 padded batch rows.
    x = jax.random.normal(kx, (2, 4, 2, 16), jnp.float32)
    y = mlp_forward(x, pparams)
    jax.block_until_ready(y)
    ref = _reference(x.reshape(-1, input_dim), params)
    assert y.shape == (8, output), y.shape
    assert jnp.allclose(y.astype(jnp.float32), ref, atol=5e-2, rtol=5e-2), float(
        jnp.max(jnp.abs(y.astype(jnp.float32) - ref)))

    # Test 2: larger batch (512 rows) — single-tile split into a 2-step grid so both
    # v7x TensorCores get work.
    x_big = jax.random.normal(kx2, (512, input_dim), jnp.float32)
    y_big = mlp_forward(x_big, pparams)
    jax.block_until_ready(y_big)
    ref_big = _reference(x_big, params)
    assert y_big.shape == (512, output), y_big.shape
    assert jnp.allclose(y_big.astype(jnp.float32), ref_big, atol=5e-2, rtol=5e-2), float(
        jnp.max(jnp.abs(y_big.astype(jnp.float32) - ref_big)))

    # Test 3: ragged batch (600 rows) — exercises row padding + multi-step grid.
    x_rag = jax.random.normal(kx3, (600, input_dim), jnp.float32)
    y_rag = mlp_forward(x_rag, pparams)
    jax.block_until_ready(y_rag)
    ref_rag = _reference(x_rag, params)
    assert y_rag.shape == (600, output), y_rag.shape
    assert jnp.allclose(y_rag.astype(jnp.float32), ref_rag, atol=5e-2, rtol=5e-2), float(
        jnp.max(jnp.abs(y_rag.astype(jnp.float32) - ref_rag)))

    print("KERNEL_OK")
</pallas_src>

<mosaic_0001>
module attributes {stable_mosaic.version = 11 : i64} {
  func.func @_mlp_kernel(%arg0: i32, %arg1: memref<16x32xf32, #tpu.memory_space<vmem>>, %arg2: memref<32x128xbf16, #tpu.memory_space<vmem>>, %arg3: memref<1x128xf32, #tpu.memory_space<vmem>>, %arg4: memref<128x128xbf16, #tpu.memory_space<vmem>>, %arg5: memref<1x128xf32, #tpu.memory_space<vmem>>, %arg6: memref<128x16xbf16, #tpu.memory_space<vmem>>, %arg7: memref<1x16xf32, #tpu.memory_space<vmem>>, %arg8: memref<16x16xbf16, #tpu.memory_space<vmem>>) attributes {dimension_semantics = [#tpu.dimension_semantics<parallel>], iteration_bounds = array<i64: 1>, scalar_prefetch = 0 : i64, scratch_operands = 0 : i64, tpu.core_type = #tpu.core_type<tc>, window_params = [{transform_indices = @transform_0, window_bounds = array<i64: 16, 32>}, {pipeline_mode = #tpu.pipeline_mode<synchronous>, transform_indices = @transform_1, window_bounds = array<i64: 32, 128>}, {pipeline_mode = #tpu.pipeline_mode<synchronous>, transform_indices = @transform_2, window_bounds = array<i64: 1, 128>}, {pipeline_mode = #tpu.pipeline_mode<synchronous>, transform_indices = @transform_3, window_bounds = array<i64: 128, 128>}, {pipeline_mode = #tpu.pipeline_mode<synchronous>, transform_indices = @transform_4, window_bounds = array<i64: 1, 128>}, {pipeline_mode = #tpu.pipeline_mode<synchronous>, transform_indices = @transform_5, window_bounds = array<i64: 128, 16>}, {pipeline_mode = #tpu.pipeline_mode<synchronous>, transform_indices = @transform_6, window_bounds = array<i64: 1, 16>}, {transform_indices = @transform_7, window_bounds = array<i64: 16, 16>}]} {
    %c0 = arith.constant 0 : index
    %c0_0 = arith.constant 0 : index
    %0 = vector.load %arg1[%c0, %c0_0] : memref<16x32xf32, #tpu.memory_space<vmem>>, vector<16x32xf32>
    %1 = arith.truncf %0 : vector<16x32xf32> to vector<16x32xbf16>
    %c0_1 = arith.constant 0 : index
    %c0_2 = arith.constant 0 : index
    %2 = vector.load %arg2[%c0_1, %c0_2] : memref<32x128xbf16, #tpu.memory_space<vmem>>, vector<32x128xbf16>
    %cst = arith.constant dense<0.000000e+00> : vector<16x128xf32>
    %3 = tpu.matmul %1, %2, %cst {dimension_numbers = #tpu.dot_dimension_numbers<[1], [0], [0], [1], [0, 0, 1, 1], [], []>} : vector<16x32xbf16>, vector<32x128xbf16>, vector<16x128xf32> -> vector<16x128xf32>
    %c0_3 = arith.constant 0 : index
    %c0_4 = arith.constant 0 : index
    %4 = vector.load %arg3[%c0_3, %c0_4] : memref<1x128xf32, #tpu.memory_space<vmem>>, vector<1x128xf32>
    %5 = vector.broadcast %4 : vector<1x128xf32> to vector<16x128xf32>
    %6 = arith.addf %3, %5 : vector<16x128xf32>
    %cst_5 = arith.constant 0.000000e+00 : f32
    %7 = vector.broadcast %cst_5 : f32 to vector<16x128xf32>
    %8 = arith.maximumf %6, %7 : vector<16x128xf32>
    %9 = arith.truncf %8 : vector<16x128xf32> to vector<16x128xbf16>
    %c0_6 = arith.constant 0 : index
    %c0_7 = arith.constant 0 : index
    %10 = vector.load %arg4[%c0_6, %c0_7] : memref<128x128xbf16, #tpu.memory_space<vmem>>, vector<128x128xbf16>
    %cst_8 = arith.constant dense<0.000000e+00> : vector<16x128xf32>
    %11 = tpu.matmul %9, %10, %cst_8 {dimension_numbers = #tpu.dot_dimension_numbers<[1], [0], [0], [1], [0, 0, 1, 1], [], []>} : vector<16x128xbf16>, vector<128x128xbf16>, vector<16x128xf32> -> vector<16x128xf32>
    %c0_9 = arith.constant 0 : index
    %c0_10 = arith.constant 0 : index
    %12 = vector.load %arg5[%c0_9, %c0_10] : memref<1x128xf32, #tpu.memory_space<vmem>>, vector<1x128xf32>
    %13 = vector.broadcast %12 : vector<1x128xf32> to vector<16x128xf32>
    %14 = arith.addf %11, %13 : vector<16x128xf32>
    %cst_11 = arith.constant 0.000000e+00 : f32
    %15 = vector.broadcast %cst_11 : f32 to vector<16x128xf32>
    %16 = arith.maximumf %14, %15 : vector<16x128xf32>
    %17 = arith.truncf %16 : vector<16x128xf32> to vector<16x128xbf16>
    %c0_12 = arith.constant 0 : index
    %c0_13 = arith.constant 0 : index
    %18 = vector.load %arg6[%c0_12, %c0_13] : memref<128x16xbf16, #tpu.memory_space<vmem>>, vector<128x16xbf16>
    %cst_14 = arith.constant dense<0.000000e+00> : vector<16x16xf32>
    %19 = tpu.matmul %17, %18, %cst_14 {dimension_numbers = #tpu.dot_dimension_numbers<[1], [0], [0], [1], [0, 0, 1, 1], [], []>} : vector<16x128xbf16>, vector<128x16xbf16>, vector<16x16xf32> -> vector<16x16xf32>
    %c0_15 = arith.constant 0 : index
    %c0_16 = arith.constant 0 : index
    %20 = vector.load %arg7[%c0_15, %c0_16] : memref<1x16xf32, #tpu.memory_space<vmem>>, vector<1x16xf32>
    %21 = vector.broadcast %20 : vector<1x16xf32> to vector<16x16xf32>
    %22 = arith.addf %19, %21 : vector<16x16xf32>
    %23 = arith.truncf %22 : vector<16x16xf32> to vector<16x16xbf16>
    %c0_17 = arith.constant 0 : index
    %c0_18 = arith.constant 0 : index
    %24 = vector.load %arg8[%c0_17, %c0_18] : memref<16x16xbf16, #tpu.memory_space<vmem>>, vector<16x16xbf16>
    tpu.vector_store %arg8[%c0_17, %c0_18], %23 {strides = array<i32>} : memref<16x16xbf16, #tpu.memory_space<vmem>>, vector<16x16xbf16>,
    return
  }
  func.func @transform_0(%arg0: i32) -> (i32, i32) {
    %c0_i32 = arith.constant 0 : i32
    %c0_i32_0 = arith.constant 0 : i32
    return %arg0, %c0_i32 : i32, i32
  }
  func.func @transform_1(%arg0: i32) -> (i32, i32) {
    %c0_i32 = arith.constant 0 : i32
    %c0_i32_0 = arith.constant 0 : i32
    %c0_i32_1 = arith.constant 0 : i32
    return %c0_i32, %c0_i32_0 : i32, i32
  }
  func.func @transform_2(%arg0: i32) -> (i32, i32) {
    %c0_i32 = arith.constant 0 : i32
    %c0_i32_0 = arith.constant 0 : i32
    %c0_i32_1 = arith.constant 0 : i32
    return %c0_i32, %c0_i32_0 : i32, i32
  }
  func.func @transform_3(%arg0: i32) -> (i32, i32) {
    %c0_i32 = arith.constant 0 : i32
    %c0_i32_0 = arith.constant 0 : i32
    %c0_i32_1 = arith.constant 0 : i32
    return %c0_i32, %c0_i32_0 : i32, i32
  }
  func.func @transform_4(%arg0: i32) -> (i32, i32) {
    %c0_i32 = arith.constant 0 : i32
    %c0_i32_0 = arith.constant 0 : i32
    %c0_i32_1 = arith.constant 0 : i32
    return %c0_i32, %c0_i32_0 : i32, i32
  }
  func.func @transform_5(%arg0: i32) -> (i32, i32) {
    %c0_i32 = arith.constant 0 : i32
    %c0_i32_0 = arith.constant 0 : i32
    %c0_i32_1 = arith.constant 0 : i32
    return %c0_i32, %c0_i32_0 : i32, i32
  }
  func.func @transform_6(%arg0: i32) -> (i32, i32) {
    %c0_i32 = arith.constant 0 : i32
    %c0_i32_0 = arith.constant 0 : i32
    %c0_i32_1 = arith.constant 0 : i32
    return %c0_i32, %c0_i32_0 : i32, i32
  }
  func.func @transform_7(%arg0: i32) -> (i32, i32) {
    %c0_i32 = arith.constant 0 : i32
    %c0_i32_0 = arith.constant 0 : i32
    return %arg0, %c0_i32 : i32, i32
  }
}

</mosaic_0001>

<bundles_post_ra>
// kernel: mlp_forward.1
= control target key start
LH: loop header
LB: loop body
LE: loop exit
PB: predicated region body
PF: predicated region fallthrough
CT: control target
= control target key end

     0   :  { %v458_v0 = vmov 0.0   ;;  %vm459_vm0 = vmmov 0   ;;  %vm53_vm1 = vcmask 261120   ;;  %vm336_vm2 = vcmask 125952   ;;  %s599_s1 = inlined_call_operand.vmem [shape: bf16[32,128], index: 1, kind: input, shape index: {}]   ;;  %s600_s0 = inlined_call_operand.vmem [shape: f32[16,32], index: 0, kind: input, shape index: {}]   ;;  %s601_s3 = inlined_call_operand.vmem [shape: bf16[128,128], index: 3, kind: input, shape index: {}]   ;;  %s602_s5 = inlined_call_operand.vmem [shape: bf16[128,16], index: 5, kind: input, shape index: {}]   ;;  %s603_s2 = inlined_call_operand.vmem [shape: f32[1,128], index: 2, kind: input, shape index: {}]   ;;  %s604_s4 = inlined_call_operand.vmem [shape: f32[1,128], index: 4, kind: input, shape index: {}]   ;;  %s605_s6 = inlined_call_operand.vmem [shape: f32[1,16], index: 6, kind: input, shape index: {}]   ;;  %s606_s7 = inlined_call_operand.vmem [shape: bf16[16,16], index: 7, kind: output, shape index: {}]  }
   0x1   :  { %390 = vmatprep.subr.bf16.mxu0 %v458_v0  ;;  %v440_v1 = vld [vmem:[%s599_s1 + $0x8] sm:$0xff]   ;;  %394 = vmatprep.mubr.msk.bf16.mxu0 %vm459_vm0, %v458_v0  ;;  %v441_v2 = vld [vmem:[%s599_s1] sm:$0xff]   ;;  %v442_v5 = vld [vmem:[%s601_s3 + $0x38] sm:$0xff]  }
   0x2   :  { %398 = vmatprep.subr.bf16.mxu1 %v458_v0  ;;  %414 = vmatprep.mubr.msk.bf16.mxu1 %vm459_vm0, %v458_v0  ;;  %v27_v3 = vld [vmem:[%s600_s0] sm:$0xff]  ;;  %v28_v4 = vld [vmem:[%s600_s0 + $0x8] sm:$0xff]  ;;  %v443_v7 = vld [vmem:[%s601_s3 + $0x30] sm:$0xff]  }
   0x3   :  { %391 = vmatpush3.bf16.msra.mxu0 %v440_v1  ;;  %v29_v6 = vpack.c.bf16 %v28_v4, %v27_v3  ;;  %399 = vmatpush3.bf16.msra.mxu1 %v442_v5  ;;  %v444_v8 = vld [vmem:[%s601_s3 + $0x28] sm:$0xff]   ;;  %v445_v9 = vld [vmem:[%s601_s3 + $0x20] sm:$0xff]   ;;  %v446_v10 = vld [vmem:[%s601_s3 + $0x18] sm:$0xff]  }
   0x4   :  { %392 = vmatprep.subr.bf16.mxu0 %v458_v0  ;;  %400 = vmatprep.subr.bf16.mxu1 %v458_v0  ;;  %v447_v11 = vld [vmem:[%s601_s3 + $0x10] sm:$0xff]   ;;  %v448_v12 = vld [vmem:[%s601_s3 + $0x8] sm:$0xff]   ;;  %v449_v13 = vld [vmem:[%s601_s3] sm:$0xff]  }
   0x5   :  { %v450_v14 = vld [vmem:[%s602_s5 + $0x38] sm:$0xff]   ;;  %v451_v15 = vld [vmem:[%s602_s5 + $0x30] sm:$0xff]   ;;  %v452_v16 = vld [vmem:[%s602_s5 + $0x28] sm:$0xff]  }
   0x6   :  { %v453_v17 = vld [vmem:[%s602_s5 + $0x20] sm:$0xff]   ;;  %v454_v18 = vld [vmem:[%s602_s5 + $0x18] sm:$0xff]   ;;  %v455_v29 = vld [vmem:[%s602_s5 + $0x10] sm:$0xff]  }
   0x7   :  { %393 = vmatpush3.bf16.msra.mxu0 %v441_v2  ;;  %401 = vmatpush3.bf16.msra.mxu1 %v443_v7  ;;  %v343_v19 = vld [vmem:[%s603_s2] ss:$0 sm:$0xff]  ;;  %v456_v30 = vld [vmem:[%s602_s5 + $0x8] sm:$0xff]  }
   0x8   :  { %418 = vmatprep.subr.bf16.mxu0 %v458_v0  ;;  %402 = vmatprep.subr.bf16.mxu1 %v458_v0  ;;  %v457_v31 = vld [vmem:[%s602_s5] sm:$0xff]  }
   0x9   :  { %v347_v32 = vld [vmem:[%s604_s4] ss:$0 sm:$0xff] }
   0xa   :  { %395 = vmatmul.mubr.msk.bf16.vlgmr.msra.gmra.mxu0 %vm53_vm1, %v29_v6  ;;  %v356_v42 = vld [vmem:[%s605_s6] ss:$0 sm:$0xff] }
   0xb   :  { %434 = vmatprep.mubr.msk.bf16.mxu0 %vm459_vm0, %v458_v0  ;;  %403 = vmatpush3.bf16.msra.mxu1 %v444_v8 }
   0xc   :  { %404 = vmatprep.subr.bf16.mxu1 %v458_v0  ;;  %419 = vmatpush3.bf16.msra.mxu0 %v450_v14 }
   0xd   :  { %420 = vmatprep.subr.bf16.mxu0 %v458_v0 }
   0xf   :  { %405 = vmatpush3.bf16.msra.mxu1 %v445_v9 }
  0x10   :  { %406 = vmatprep.subr.bf16.mxu1 %v458_v0  ;;  %421 = vmatpush3.bf16.msra.mxu0 %v451_v15 }
  0x11   :  { %422 = vmatprep.subr.bf16.mxu0 %v458_v0 }
  0x13   :  { %407 = vmatpush3.bf16.msra.mxu1 %v446_v10 }
  0x14   :  { %408 = vmatprep.subr.bf16.mxu1 %v458_v0  ;;  %423 = vmatpush3.bf16.msra.mxu0 %v452_v16 }
  0x15   :  { %424 = vmatprep.subr.bf16.mxu0 %v458_v0 }
  0x17   :  { %409 = vmatpush3.bf16.msra.mxu1 %v447_v11 }
  0x18   :  { %410 = vmatprep.subr.bf16.mxu1 %v458_v0  ;;  %425 = vmatpush3.bf16.msra.mxu0 %v453_v17 }
  0x19   :  { %426 = vmatprep.subr.bf16.mxu0 %v458_v0 }
  0x1b   :  { %411 = vmatpush3.bf16.msra.mxu1 %v448_v12 }
  0x1c   :  { %412 = vmatprep.subr.bf16.mxu1 %v458_v0  ;;  %427 = vmatpush3.bf16.msra.mxu0 %v454_v18 }
  0x1d   :  { %428 = vmatprep.subr.bf16.mxu0 %v458_v0 }
  0x1f   :  { %413 = vmatpush3.bf16.msra.mxu1 %v449_v13 }
  0x20   :  { %429 = vmatpush3.bf16.msra.mxu0 %v455_v29 }
  0x21   :  { %430 = vmatprep.subr.bf16.mxu0 %v458_v0 }
  0x24   :  { %431 = vmatpush3.bf16.msra.mxu0 %v456_v30 }
  0x25   :  { %432 = vmatprep.subr.bf16.mxu0 %v458_v0 }
  0x28   :  { %433 = vmatpush3.bf16.msra.mxu0 %v457_v31 }
  0xca   :  { %v91_v20 = vpop.f32.mrf.mxu0 }
  0xcb   :  { %v92_v22 = vadd.f32 %v343_v19, %v91_v20 }
  0xcc   :  { %v396_v21 = vpop.f32.mrf.mxu0 }
  0xcd   :  { %v98_v26 = vmax.f32 %v92_v22, 0.0 }
  0xce   :  { %v94_v23 = vpop.f32.mrf.mxu0 }
  0xcf   :  { %v95_v24 = vadd.f32 %v343_v19, %v94_v23 }
  0xd0   :  { %v397_v25 = vpop.f32.mrf.mxu0 }
  0xd1   :  { %v99_v27 = vmax.f32 %v95_v24, 0.0 }
  0xd3   :  { %v100_v28 = vpack.c.bf16 %v99_v27, %v98_v26 }
  0xd5   :  { %415 = vmatmul.mubr.bf16.vlgmr.msra.gmra.mxu1 %v100_v28 }
 0x195   :  { %v206_v33 = vpop.f32.mrf.mxu1 }
 0x196   :  { %v207_v35 = vadd.f32 %v347_v32, %v206_v33 }
 0x197   :  { %v416_v34 = vpop.f32.mrf.mxu1 }
 0x198   :  { %v213_v39 = vmax.f32 %v207_v35, 0.0 }
 0x199   :  { %v209_v36 = vpop.f32.mrf.mxu1 }
 0x19a   :  { %v210_v37 = vadd.f32 %v347_v32, %v209_v36 }
 0x19b   :  { %v417_v38 = vpop.f32.mrf.mxu1 }
 0x19c   :  { %v214_v40 = vmax.f32 %v210_v37, 0.0 }
 0x19e   :  { %v215_v41 = vpack.c.bf16 %v214_v40, %v213_v39 }
 0x1a0   :  { %435 = vmatmul.mubr.bf16.vlgmr.msra.gmra.mxu0 %v215_v41 }
 0x260   :  { %v321_v43 = vpop.f32.mrf.mxu0 }
 0x261   :  { %v322_v44 = vadd.f32 %v356_v42, %v321_v43 }
 0x262   :  { %v436_v45 = vpop.f32.mrf.mxu0 }
 0x263   :  { %v367_v46 = vpack.c.bf16 %v322_v44, %v322_v44 }
 0x264   :  { %v324_v47 = vpop.f32.mrf.mxu0 }
 0x265   :  { %337 = vst.msk [vmem:[%s606_s7] sm:$0xf] %vm336_vm2, %v367_v46  ;;  %v325_v48 = vadd.f32 %v356_v42, %v324_v47 }
 0x266   :  { %v437_v49 = vpop.f32.mrf.mxu0 }
 0x267   :  { %v368_v50 = vpack.c.bf16 %v325_v48, %v325_v48 }
 0x269   :  { %338 = vst.msk [vmem:[%s606_s7 + $0x4] sm:$0xf] %vm336_vm2, %v368_v50 }

</bundles_post_ra>
